<compile_context>
chip_gen: v5e
topology: v5e:2x2
jax: 0.10.0
libtpu: 0.0.40
codegen_flags: <defaults>
</compile_context>

<pallas_src>
import functools
import math

import jax
import jax.numpy as jnp
from jax import lax
from jax.experimental import pallas as pl
from jax.experimental.pallas import tpu as pltpu


# ----------------------------------------------------------------------------
# Pallas kernel: one (batch, head) pair per grid step.
# Blocks are (1, chn, T): channels on sublanes, tokens on lanes.
# ----------------------------------------------------------------------------
def _qkv_attention_kernel(q_ref, k_ref, v_ref, o_ref, *, scale):
    q = q_ref[0]                      # (chn, T), input dtype
    k = k_ref[0]                      # (chn, T)
    v = v_ref[0]                      # (chn, T)

    # logits[t, s] = sum_c q[c, t] * k[c, s]   (contract the sublane/channel axis)
    logits = lax.dot_general(q, k, (((0,), (0,)), ((), ())),
                             preferred_element_type=jnp.float32)
    logits = logits * scale           # combined q*k scale, applied once in f32

    # numerically-stable softmax in f32 (matches torch.softmax(weight.float(), -1))
    logits = logits - jnp.max(logits, axis=-1, keepdims=True)
    p = jnp.exp(logits)
    denom = jnp.sum(p, axis=-1, keepdims=True)
    if q_ref.dtype == jnp.bfloat16:
        # EUP reciprocal (separate VLIW slot); bf16 rounding dominates its error.
        p = p * pl.reciprocal(denom, approx=True)
    else:
        p = p / denom

    # torch casts the softmax weights back to the input dtype before the PV matmul
    p = p.astype(v.dtype)

    # a[c, t] = sum_s p[t, s] * v[c, s]
    out = lax.dot_general(v, p, (((1,), (1,)), ((), ())),
                          preferred_element_type=jnp.float32)    # (chn, T)
    o_ref[0] = out.astype(o_ref.dtype)


# ----------------------------------------------------------------------------
# Wrapper: pure glue, no layout changes on the data path.
# ----------------------------------------------------------------------------
def qkv_attention_legacy(qkv, n_heads):
    b, width, length = qkv.shape
    assert width % (3 * n_heads) == 0
    chn = width // (3 * n_heads)
    # Sublane-tiling requirement for the (1, chn, T) blocks.
    # TODO(synk): chn < 8 (not a multiple of 8) would need a padded/fallback path.
    assert chn % 8 == 0, "head channel count must be a multiple of 8 on TPU"

    scale = 1.0 / math.sqrt(chn)      # == (chn ** -0.25) ** 2
    kernel = functools.partial(_qkv_attention_kernel, scale=scale)

    # Width-axis layout (from the PyTorch reshape) is (head, {q,k,v}, chn):
    # q of head h lives at width block 3*h, k at 3*h+1, v at 3*h+2 (block = chn rows).
    q_spec = pl.BlockSpec((1, chn, length), lambda bi, hi: (bi, 3 * hi + 0, 0))
    k_spec = pl.BlockSpec((1, chn, length), lambda bi, hi: (bi, 3 * hi + 1, 0))
    v_spec = pl.BlockSpec((1, chn, length), lambda bi, hi: (bi, 3 * hi + 2, 0))
    out_spec = pl.BlockSpec((1, chn, length), lambda bi, hi: (bi, hi, 0))

    itemsize = jnp.dtype(qkv.dtype).itemsize
    cost = pl.CostEstimate(
        flops=4 * b * n_heads * chn * length * length,        # QK^T + PV matmuls
        transcendentals=b * n_heads * length * length,        # exp
        bytes_accessed=(b * width * length + b * n_heads * chn * length) * itemsize,
    )

    return pl.pallas_call(
        kernel,
        out_shape=jax.ShapeDtypeStruct((b, n_heads * chn, length), qkv.dtype),
        grid_spec=pltpu.PrefetchScalarGridSpec(
            num_scalar_prefetch=0,
            grid=(b, n_heads),
            in_specs=[q_spec, k_spec, v_spec],
            out_specs=out_spec,
        ),
        compiler_params=pltpu.CompilerParams(
            dimension_semantics=("parallel", "parallel")),
        cost_estimate=cost,
    )(qkv, qkv, qkv)


# ----------------------------------------------------------------------------
# Pure-JAX reference mirroring the PyTorch module's math.
# ----------------------------------------------------------------------------
def _reference(qkv, n_heads):
    b, width, length = qkv.shape
    chn = width // (3 * n_heads)
    qkv_r = qkv.reshape(b * n_heads, 3 * chn, length)
    q, k, v = qkv_r[:, :chn], qkv_r[:, chn:2 * chn], qkv_r[:, 2 * chn:]
    scale = 1.0 / math.sqrt(chn)
    logits = jnp.einsum("bct,bcs->bts", q, k,
                        preferred_element_type=jnp.float32) * scale
    w = jax.nn.softmax(logits, axis=-1).astype(qkv.dtype)
    a = jnp.einsum("bts,bcs->bct", w, v,
                   preferred_element_type=jnp.float32).astype(qkv.dtype)
    return a.reshape(b, n_heads * chn, length)


if __name__ == "__main__":
    # small shapes consistent with the module: B=2, n_heads=2, chn=64, T=128
    B, HEADS, CHN, T = 2, 2, 64, 128
    W = 3 * HEADS * CHN

    key = jax.random.PRNGKey(0)
    qkv = jax.random.normal(key, (B, W, T), dtype=jnp.float32)

    # f32 path
    out = jax.block_until_ready(qkv_attention_legacy(qkv, HEADS))
    ref = _reference(qkv, HEADS)
    assert out.shape == (B, HEADS * CHN, T)
    assert jnp.allclose(out, ref, atol=2e-3, rtol=2e-3), "f32 mismatch vs reference"

    # bf16 path (native MXU feed, f32 accumulation) vs a bf16-input reference
    qkv_bf = qkv.astype(jnp.bfloat16)
    out_bf = jax.block_until_ready(qkv_attention_legacy(qkv_bf, HEADS))
    ref_bf = _reference(qkv_bf, HEADS)
    assert out_bf.dtype == jnp.bfloat16
    assert jnp.allclose(out_bf.astype(jnp.float32), ref_bf.astype(jnp.float32),
                        atol=5e-2, rtol=5e-2), "bf16 mismatch vs reference"

    # TODO(synk): count_flops_attn / thop profiling hook is tooling-only, not part
    #             of the forward pass; nothing to translate.
    print("KERNEL_OK")
</pallas_src>

<mosaic_0001>
module attributes {stable_mosaic.version = 11 : i64} {
  func.func @_qkv_attention_kernel(%arg0: i32, %arg1: i32, %arg2: memref<1x64x128xf32, #tpu.memory_space<vmem>>, %arg3: memref<1x64x128xf32, #tpu.memory_space<vmem>>, %arg4: memref<1x64x128xf32, #tpu.memory_space<vmem>>, %arg5: memref<1x64x128xf32, #tpu.memory_space<vmem>>) attributes {dimension_semantics = [#tpu.dimension_semantics<parallel>, #tpu.dimension_semantics<parallel>], iteration_bounds = array<i64: 2, 2>, scalar_prefetch = 0 : i64, scratch_operands = 0 : i64, tpu.core_type = #tpu.core_type<tc>, window_params = [{transform_indices = @transform_0, window_bounds = array<i64: 1, 64, 128>}, {transform_indices = @transform_1, window_bounds = array<i64: 1, 64, 128>}, {transform_indices = @transform_2, window_bounds = array<i64: 1, 64, 128>}, {transform_indices = @transform_3, window_bounds = array<i64: 1, 64, 128>}]} {
    %c0 = arith.constant 0 : index
    %c0_0 = arith.constant 0 : index
    %c0_1 = arith.constant 0 : index
    %0 = vector.load %arg2[%c0, %c0_0, %c0_1] : memref<1x64x128xf32, #tpu.memory_space<vmem>>, vector<1x64x128xf32>
    %1 = vector.shape_cast %0 : vector<1x64x128xf32> to vector<64x128xf32>
    %c0_2 = arith.constant 0 : index
    %c0_3 = arith.constant 0 : index
    %c0_4 = arith.constant 0 : index
    %2 = vector.load %arg3[%c0_2, %c0_3, %c0_4] : memref<1x64x128xf32, #tpu.memory_space<vmem>>, vector<1x64x128xf32>
    %3 = vector.shape_cast %2 : vector<1x64x128xf32> to vector<64x128xf32>
    %c0_5 = arith.constant 0 : index
    %c0_6 = arith.constant 0 : index
    %c0_7 = arith.constant 0 : index
    %4 = vector.load %arg4[%c0_5, %c0_6, %c0_7] : memref<1x64x128xf32, #tpu.memory_space<vmem>>, vector<1x64x128xf32>
    %5 = vector.shape_cast %4 : vector<1x64x128xf32> to vector<64x128xf32>
    %cst = arith.constant dense<0.000000e+00> : vector<128x128xf32>
    %6 = tpu.matmul %1, %3, %cst {dimension_numbers = #tpu.dot_dimension_numbers<[0], [0], [1], [1], [0, 1, 1, 1], [], []>} : vector<64x128xf32>, vector<64x128xf32>, vector<128x128xf32> -> vector<128x128xf32>
    %cst_8 = arith.constant 1.250000e-01 : f32
    %7 = vector.broadcast %cst_8 : f32 to vector<128x128xf32>
    %8 = arith.mulf %6, %7 : vector<128x128xf32>
    %cst_9 = arith.constant dense<0xFF800000> : vector<128xf32>
    %9 = vector.multi_reduction <maximumf>, %8, %cst_9 [1] : vector<128x128xf32> to vector<128xf32>
    %10 = vector.shape_cast %9 : vector<128xf32> to vector<128x1xf32>
    %11 = vector.broadcast %10 : vector<128x1xf32> to vector<128x128xf32>
    %12 = arith.subf %8, %11 : vector<128x128xf32>
    %13 = math.exp %12 : vector<128x128xf32>
    %cst_10 = arith.constant dense<0.000000e+00> : vector<128xf32>
    %14 = vector.multi_reduction <add>, %13, %cst_10 [1] : vector<128x128xf32> to vector<128xf32>
    %15 = vector.shape_cast %14 : vector<128xf32> to vector<128x1xf32>
    %16 = vector.broadcast %15 : vector<128x1xf32> to vector<128x128xf32>
    %17 = arith.divf %13, %16 : vector<128x128xf32>
    %cst_11 = arith.constant dense<0.000000e+00> : vector<64x128xf32>
    %18 = tpu.matmul %5, %17, %cst_11 {dimension_numbers = #tpu.dot_dimension_numbers<[1], [1], [0], [0], [0, 0, 1, 0], [], []>} : vector<64x128xf32>, vector<128x128xf32>, vector<64x128xf32> -> vector<64x128xf32>
    %c0_12 = arith.constant 0 : index
    %c0_13 = arith.constant 0 : index
    %c0_14 = arith.constant 0 : index
    %19 = vector.load %arg5[%c0_12, %c0_13, %c0_14] : memref<1x64x128xf32, #tpu.memory_space<vmem>>, vector<1x64x128xf32>
    %20 = vector.shape_cast %19 : vector<1x64x128xf32> to vector<64x128xf32>
    %21 = vector.shape_cast %18 : vector<64x128xf32> to vector<1x64x128xf32>
    tpu.vector_store %arg5[%c0_12, %c0_13, %c0_14], %21 {strides = array<i32>} : memref<1x64x128xf32, #tpu.memory_space<vmem>>, vector<1x64x128xf32>,
    return
  }
  func.func @transform_0(%arg0: i32, %arg1: i32) -> (i32, i32, i32) {
    %c3_i32 = arith.constant 3 : i32
    %0 = arith.muli %c3_i32, %arg1 : i32
    %c0_i32 = arith.constant 0 : i32
    %1 = arith.addi %0, %c0_i32 : i32
    %c0_i32_0 = arith.constant 0 : i32
    %c0_i32_1 = arith.constant 0 : i32
    return %arg0, %1, %c0_i32_0 : i32, i32, i32
  }
  func.func @transform_1(%arg0: i32, %arg1: i32) -> (i32, i32, i32) {
    %c3_i32 = arith.constant 3 : i32
    %0 = arith.muli %c3_i32, %arg1 : i32
    %c1_i32 = arith.constant 1 : i32
    %1 = arith.addi %0, %c1_i32 : i32
    %c0_i32 = arith.constant 0 : i32
    %c0_i32_0 = arith.constant 0 : i32
    return %arg0, %1, %c0_i32 : i32, i32, i32
  }
  func.func @transform_2(%arg0: i32, %arg1: i32) -> (i32, i32, i32) {
    %c3_i32 = arith.constant 3 : i32
    %0 = arith.muli %c3_i32, %arg1 : i32
    %c2_i32 = arith.constant 2 : i32
    %1 = arith.addi %0, %c2_i32 : i32
    %c0_i32 = arith.constant 0 : i32
    %c0_i32_0 = arith.constant 0 : i32
    return %arg0, %1, %c0_i32 : i32, i32, i32
  }
  func.func @transform_3(%arg0: i32, %arg1: i32) -> (i32, i32, i32) {
    %c0_i32 = arith.constant 0 : i32
    %c0_i32_0 = arith.constant 0 : i32
    return %arg0, %arg1, %c0_i32 : i32, i32, i32
  }
}

</mosaic_0001>

<bundles_post_ra>
// kernel: tpu_custom_call.1
= control target key start
LH: loop header
LB: loop body
LE: loop exit
PB: predicated region body
PF: predicated region fallthrough
CT: control target
= control target key end

     0   :  { %s2364_s0 = inlined_call_operand.hbm [shape: f32[2,384,128], index: 0, kind: input, shape index: {}]   ;;  %s2365_s1 = inlined_call_operand.hbm [shape: f32[2,384,128], index: 1, kind: input, shape index: {}]   ;;  %s2366_s2 = inlined_call_operand.hbm [shape: f32[2,384,128], index: 2, kind: input, shape index: {}]   ;;  %s2367_s3 = inlined_call_operand.hbm [shape: f32[2,128,128], index: 3, kind: output, shape index: {}]  }
   0x1   :  { %2380 = sst [smem:[#allocation27_spill]] %s2364_s0 }
   0x2   :  { %2381 = sst [smem:[#allocation28_spill]] %s2365_s1 }
   0x3   :  { %2382 = sst [smem:[#allocation29_spill]] %s2366_s2 }
   0x4   :  { %2383 = sst [smem:[#allocation30_spill]] %s2367_s3 }
   0x5   :  { %8 = vsyncpa [#allocation3], 0 }
   0x6   :  { %10 = vsyncpa [#allocation3 + $0x1], 0 }
   0x7   :  { %11 = vsyncpa [#allocation6], 0 }
   0x8   :  { %13 = vsyncpa [#allocation6 + $0x1], 0 }
   0x9   :  { %14 = vsyncpa [#allocation4], 0 }
   0xa   :  { %16 = vsyncpa [#allocation4 + $0x1], 0  ;;  %s1674_s12 = smov 0   ;;  %s1676_s13 = smov 0  }
   0xb   :  { %s1678_s14 = smov 0   ;;  %s1680_s15 = smov 0  }
   0xc   :  { %s1682_s16 = smov 0   ;;  %s1684_s17 = smov 0  }
   0xd   :  { %s1686_s18 = smov 0   ;;  %s1688_s19 = smov 0  }
   0xe   :  { %s1690_s20 = smov 0   ;;  %s1692_s21 = smov 0  }
   0xf   :  { %s1694_s22 = smov 0   ;;  %s1696_s23 = smov 0  }
  0x10   :  { %s1698_s24 = smov 0   ;;  %s1700_s25 = smov 0  }
  0x11   :  { %s1702_s26 = smov 0   ;;  %s1704_s27 = smov 0  }
  0x12   :  { %s1706_s28 = smov 0  }
  0x13 LB: > { %2384 = sst [smem:[#allocation13_spill]] %s1584_s12  ;;  %s1760_s29 = sadd.s32 4294967295, %s1648_s28   ;;  %s1648_s28 = sphi %s1706_s28, %s22_s28   ;;  %s1644_s27 = sphi %s1704_s27, %s2458_s27   ;;  %s1640_s26 = sphi %s1702_s26, %s2445_s26   ;;  %s1636_s25 = sphi %s1700_s25, %s2444_s25   ;;  %s1632_s24 = sphi %s1698_s24, %s2443_s24   ;;  %s1628_s23 = sphi %s1696_s23, %s2457_s23   ;;  %s1624_s22 = sphi %s1694_s22, %s2456_s22   ;;  %s1620_s21 = sphi %s1692_s21, %s2455_s21   ;;  %s1616_s20 = sphi %s1690_s20, %s2454_s20   ;;  %s1612_s19 = sphi %s1688_s19, %s2453_s19   ;;  %s1608_s18 = sphi %s1686_s18, %s2452_s18   ;;  %s1604_s17 = sphi %s1684_s17, %s2451_s17   ;;  %s1600_s16 = sphi %s1682_s16, %s2450_s16   ;;  %s1596_s15 = sphi %s1680_s15, %s2449_s15   ;;  %s1592_s14 = sphi %s1678_s14, %s2440_s14   ;;  %s1588_s13 = sphi %s1676_s13, %s2448_s13   ;;  %s1584_s12 = sphi %s1674_s12, %s2447_s12  }
  0x14   : > { %2385 = sst [smem:[#allocation14_spill]] %s1592_s14  ;;  %s31_s4 = sadd.s32 1, %s1640_s26 }
  0x15   : > { %2386 = sst [smem:[#allocation15_spill]] %s1596_s15  ;;  %s34_s5 = sadd.s32 1, %s1644_s27 }
  0x16   : > { %2387 = sst [smem:[#allocation16_spill]] %s1632_s24  ;;  %p32_p0 = scmp.ge.s32.totalorder %s31_s4, 2 }
  0x17   : > { %2388 = sst [smem:[#allocation17_spill]] %s1636_s25  ;;  %s1766_s6 = smul.u32 3, %s1640_s26 }
  0x18   : > { %2389 = sst [smem:[#allocation18_spill]] %s1640_s26  ;;  %p53_p1 = scmp.eq.s32.totalorder %s1648_s28, 0 }
  0x19   : > { %2390 = sst [smem:[#allocation19_spill]] %s1644_s27  ;;  %p59_p2 = scmp.eq.s32.totalorder %s1760_s29, 0 }
  0x1a   : > { %s2460_s4 = smov (%p32_p0, %s31_s4), 0  ;;  %s2462_s5 = smov (!%p32_p0, %s34_s5), %s1644_s27 }
  0x1b   : > { %2391 = sst [smem:[#allocation20_spill]] %s2460_s4  ;;  %s1774_s7 = smul.u32 3, %s2460_s4 }
  0x1c   : > { %s69_s8 = sadd.s32 1, %s1766_s6  ;;  %p36_p3 = scmp.ge.s32.totalorder %s2462_s5, 2 }
  0x1d   : > { %s77_s9 = sadd.s32 1, %s1616_s20  ;;  %s71_s10 = sadd.s32 1, %s1774_s7 }
  0x1e   : > { %p84_p4 = scmp.ne.s32.totalorder %s1616_s20, %s1612_s19  ;;  %s2464_s5 = smov (%p36_p3, %s2462_s5), 0 }
  0x1f   : > { %2392 = sst [smem:[#allocation21_spill]] %s2464_s5  ;;  %s73_s11 = ssub.s32 %s69_s8, %s71_s10 }
  0x20   : > { %p1785_p5 = por %p84_p4, %p53_p1  ;;  %s1791_s3 = ssub.s32 %s1644_s27, %s2464_s5 }
  0x21   : > { %p90_p6 = scmp.ne.s32.totalorder %s1612_s19, %s1608_s18  ;;  %s74_s25 = sor.u32 %s73_s11, %s1791_s3 }
  0x22   : > { %p75_p7 = scmp.eq.s32.totalorder %s74_s25, 0  ;;  %s133_s10 = ssub.s32 %s1640_s26, %s2460_s4 }
  0x23   : > { %p1799_p8 = por %p90_p6, %p59_p2  ;;  %s137_s2 = sadd.s32 1, %s1592_s14 }
  0x24   : > { %s1807_s5 = scalar_select %p75_p7, %s1616_s20, %s77_s9  }
  0x25   : > { %s134_s15 = sor.u32 %s133_s10, %s1791_s3  ;;  %p147_p9 = scmp.ne.s32.totalorder %s1592_s14, %s1588_s13 }
  0x26   : > { %2395 = sst [smem:[#allocation22_spill]] %s1807_s5  ;;  %p135_p10 = scmp.eq.s32.totalorder %s134_s15, 0 }
  0x27   : > { %p148_p11 = scmp.eq.s32.totalorder %s1760_s29, 3  ;;  %p153_p12 = scmp.ne.s32.totalorder %s1588_s13, %s1584_s12 }
  0x28   : > { %s2396_s18 = sadd.s32 4294967294, %s1648_s28   ;;  %p1173_p4 = scmp.lt.s32.totalorder %s1648_s28, 4 }
  0x29   : > { %p154_p13 = scmp.eq.s32.totalorder %s2396_s18, 3  ;;  %p1820_p0 = por %p148_p11, %p147_p9 }
  0x2a   : > { %s1818_s25 = scalar_select %p135_p10, %s1592_s14, %s137_s2  }
  0x2b   : > { %s2398_s11 = scalar_select %p1820_p0, 1, 0 }
  0x2c   : > { %2397 = sst [smem:[#allocation23_spill]] %s1818_s25  ;;  %p1824_p3 = por %p154_p13, %p153_p12 }
  0x2d   : > { %2399 = sst [smem:[#allocation24_spill]] %s2398_s11  ;;  %s1075_s9 = smul.u32 24, %s1640_s26 }
  0x2e   : > { %s2400_s24 = scalar_select %p1824_p3, 1, 0 }
  0x2f   : > { %s1150_s15 = smul.u32 48, %s1644_s27  ;;  %s199_s10 = sand.u32 1, %s1648_s28  }
  0x30   : > { %2401 = sst [smem:[#allocation25_spill]] %s2400_s24  ;;  %s201_s4 = sand.u32 1, %s1616_s20  }
  0x31   : > { %s184_s18 = sadd.s32 %s1150_s15, %s1075_s9  ;;  %s1077_s5 = sshll.u32 %s201_s4, 6 }
  0x32   : > { %s1833_s2 = sshll.u32 %s184_s18, 3  ;;  %s2402_s1 = sld [smem:[#allocation28_spill]] }
  0x33   : > { %s203_s11 = scalar_lea.vmem [#allocation5], %s1077_s5  ;;  %p1163_p6 = pnand %p1173_p4, %p1785_p5 }
  0x34   : > { %s215_s27 = sshll.u32 %s203_s11, 4  ;;  %p1083_p7 = scmp.ge.s32.totalorder %s1648_s28, 1  ;;  %s216_s27 = int_to_ptr.vmem [resolvable:$true] %s215_s27 }
  0x35   : > { %p249_p9 = scmp.lt.s32.totalorder %s1648_s28, 5  ;;  %s1845_s14 = scalar_lea.sflag [#allocation6], %s199_s10 }
  0x36   : > { %s1651_s4 = smov 8   ;;  %s41_s30 = ssub.s32 %s1766_s6, %s1774_s7 }
  0x37   : > { %p1851_p10 = pnand %p1083_p7, %p249_p9  ;;  %s45_s5 = sadd.s32 1, %s1628_s23 }
  0x38   : > { %s973_s24 = scalar_lea.hbm %s2402_s1, %s1833_s2  ;;  %s42_s25 = sor.u32 %s41_s30, %s1791_s3 }
  0x39   : > { %s974_s12 = scalar_lea.hbm %s973_s24, 64  ;;  %s2378_s24 = smov 128  }
  0x3a   : > { %s213_s26 = sshll.u32 %s974_s12, 4  ;;  %p52_p5 = scmp.ne.s32.totalorder %s1628_s23, %s1624_s22  ;;  %s214_s26 = int_to_ptr.hbm [resolvable:$true] %s213_s26 }
  0x3b   : > { %1165 = dma.hbm_to_vmem [thread:$0]  (!%p1163_p6), %s214_s26, 1024, %s216_s27, %s1845_s14, %s2378_s24, %s2378_s24, %s1651_s4  }
  0x3c   : > { %p43_p11 = scmp.eq.s32.totalorder %s42_s25, 0  ;;  %p58_p12 = scmp.ne.s32.totalorder %s1624_s22, %s1620_s21 }
  0x3d   : > { %p54_p13 = por %p53_p1, %p52_p5  ;;  %s174_s11 = sand.u32 1, %s1628_s23  }
  0x3e   : > { %s1867_s9 = scalar_select %p43_p11, %s1628_s23, %s45_s5  }
  0x3f   : > { %p1871_p6 = por %p59_p2, %p58_p12  ;;  %s1074_s27 = sshll.u32 %s174_s11, 6 }
  0x40   : > { %2404 = sst [smem:[#allocation26_spill]] %s1867_s9  ;;  %s178_s5 = scalar_lea.vmem [#allocation2], %s1074_s27 }
  0x41   : > { %s2406_s0 = sld [smem:[#allocation27_spill]]  ;;  %s189_s25 = sshll.u32 %s178_s5, 4  ;;  %s190_s25 = int_to_ptr.vmem [resolvable:$true] %s189_s25 }
  0x42   : > { %s2407_s21 = sld [smem:[#allocation15_spill]]  ;;  %p1160_p7 = pnand %p1173_p4, %p54_p13 }
  0x43   : > { %s175_s24 = scalar_lea.sflag [#allocation3], %s174_s11  ;;  %s2408_s1 = smov 128  }
  0x44   : > { %s103_s15 = sadd.s32 2, %s1774_s7  ;;  %s2409_s10 = sadd.s32 2, %s1766_s6 }
  0x45   : > { %s109_s9 = sadd.s32 1, %s1604_s17  ;;  %p116_p9 = scmp.ne.s32.totalorder %s1604_s17, %s1600_s16 }
  0x46   : > { %s227_s27 = sand.u32 1, %s1604_s17  }
  0x47   : > { %s186_s18 = scalar_lea.hbm %s2406_s0, %s1833_s2  ;;  %s105_s0 = ssub.s32 %s2409_s10, %s103_s15 }
  0x48   : > { %s187_s30 = sshll.u32 %s186_s18, 4  ;;  %s106_s18 = sor.u32 %s105_s0, %s1791_s3  ;;  %s188_s30 = int_to_ptr.hbm [resolvable:$true] %s187_s30 }
  0x49   : > { %1162 = dma.hbm_to_vmem [thread:$0]  (!%p1160_p7), %s188_s30, 1024, %s190_s25, %s175_s24, %s2408_s1, %s2408_s1, %s1651_s4  }
  0x4a   : > { %p107_p5 = scmp.eq.s32.totalorder %s106_s18, 0  ;;  %p122_p11 = scmp.ne.s32.totalorder %s1600_s16, %s2407_s21 }
  0x4b   : > { %p118_p12 = por %p116_p9, %p53_p1  ;;  %s1080_s7 = sshll.u32 %s227_s27, 6 }
  0x4c   : > { %s1897_s5 = scalar_select %p107_p5, %s1604_s17, %s109_s9  }
  0x4d   : > { %p1901_p13 = por %p122_p11, %p59_p2  ;;  %s2411_s30 = sld [smem:[#allocation29_spill]] }
  0x4e   : > { %s229_s25 = scalar_lea.vmem [#allocation7], %s1080_s7  ;;  %p1166_p1 = pnand %p1173_p4, %p118_p12 }
  0x4f   : > { %s241_s15 = sshll.u32 %s229_s25, 4  ;;  %s255_s9 = sand.u32 (!%p1851_p10), 1, %s1624_s22   ;;  %s242_s15 = int_to_ptr.vmem [resolvable:$true] %s241_s15 }
  0x50   : > { %s1084_s21 = sshll.u32 (!%p1851_p10), %s255_s9, 6 }
  0x51   : > { %s1918_s18 = scalar_lea.vmem (!%p1851_p10), [#allocation2], %s1084_s21 }
  0x52   : > { %253 = sbr.rel (%p1851_p10) target bundleno = 1078 (0x436), region = 32 }
  0x53   : > { %s983_s0 = scalar_lea.hbm %s2411_s30, %s1833_s2  ;;  %s256_s2 = scalar_lea.sflag (!%p1851_p10), [#allocation3], %s255_s9 }
  0x54   : > { %s984_s3 = scalar_lea.hbm %s983_s0, 128 }
  0x55   : > { %s239_s10 = sshll.u32 %s984_s3, 4  ;;  %s240_s10 = int_to_ptr.hbm [resolvable:$true] %s239_s10 }
  0x56   : > { %1168 = dma.hbm_to_vmem [thread:$0]  (!%p1166_p1), %s240_s10, 1024, %s242_s15, %s1845_s14, %s2408_s1, %s2408_s1, %s1651_s4  }
  0x57   : > { %1567 = dma.done.wait (%p1871_p6), %s256_s2, 1024  }
  0x58   : > { %1569 = vsyncadd (%p1871_p6), %s256_s2, 4294966272  ;;  %s265_s27 = sand.u32 1, %s1760_s29   ;;  %s267_s1 = sand.u32 1, %s1612_s19  }
  0x59   : > { %s1085_s14 = sshll.u32 %s267_s1, 6  ;;  %s266_s4 = scalar_lea.sflag [#allocation6], %s265_s27 }
  0x5a   : > { %s1926_s12 = scalar_lea.vmem [#allocation5], %s1085_s14 }
  0x5b   : > { %1571 = dma.done.wait (%p1799_p8), %s266_s4, 1024  }
  0x5c   : > { %1573 = vsyncadd (%p1799_p8), %s266_s4, 4294966272  ;;  %s277_s7 = sand.u32 1, %s1600_s16  }
  0x5d   : > { %s1086_s6 = sshll.u32 %s277_s7, 6 }
  0x5e   : > { %s1933_s26 = scalar_lea.vmem [#allocation7], %s1086_s6 }
  0x5f   : > { %1575 = dma.done.wait (%p1901_p13), %s266_s4, 1024  }
  0x60   : > { %1577 = vsyncadd (%p1901_p13), %s266_s4, 4294966272  ;;  %v322_v0 = vld [vmem:[%s1918_s18] sm:$0xff]  ;;  %v323_v1 = vld [vmem:[%s1918_s18 + $0x8] sm:$0xff]  ;;  %vm378_vm0 = vcmask 523264   ;;  %s2432_s29 = sld [smem:[#allocation16_spill]]  ;;  %s310_s11 = sand.u32 1, %s1588_s13  }
  0x61   : > { %346 = vxpose.xlu0.b32.start [1/8] (short) %v322_v0, 128  ;;  %v324_v2 = vld [vmem:[%s1918_s18 + $0x10] sm:$0xff]  ;;  %v325_v3 = vld [vmem:[%s1918_s18 + $0x18] sm:$0xff]  ;;  %v335_v6 = vld [vmem:[%s1926_s12 + $0x28] sm:$0xff]  ;;  %s2433_s8 = sld [smem:[#allocation17_spill]]  ;;  %s1087_s24 = sshll.u32 %s310_s11, 6 }
  0x62   : > { %v337_v4 = vld [vmem:[%s1926_s12 + $0x38] sm:$0xff]  ;;  %v336_v5 = vld [vmem:[%s1926_s12 + $0x30] sm:$0xff]  ;;  %v334_v7 = vld [vmem:[%s1926_s12 + $0x20] sm:$0xff]  ;;  %s312_s30 = scalar_lea.vmem [#allocation8], %s1087_s24  ;;  %s2435_s2 = sld [smem:[#allocation30_spill]] }
  0x63   : > { %435 = vmatpush.msra.mxu0 %v337_v4  ;;  %1110 = vmatpush.msra.mxu2 %v337_v4  ;;  %v326_v8 = vld [vmem:[%s1918_s18 + $0x20] sm:$0xff]  ;;  %v333_v9 = vld [vmem:[%s1926_s12 + $0x18] sm:$0xff]  ;;  %v332_v10 = vld [vmem:[%s1926_s12 + $0x10] sm:$0xff]  ;;  %s924_s27 = sshll.u32 %s312_s30, 4  ;;  %s910_s14 = scalar_lea.sflag [#allocation4], %s310_s11  ;;  %s925_s27 = int_to_ptr.vmem [resolvable:$true] %s924_s27 }
  0x64   : > { %v331_v11 = vld [vmem:[%s1926_s12 + $0x8] sm:$0xff]  ;;  %v330_v12 = vld [vmem:[%s1926_s12] sm:$0xff]  ;;  %v328_v14 = vld [vmem:[%s1918_s18 + $0x30] sm:$0xff] }
  0x65   : > { %436 = vmatpush.msra.mxu0 %v336_v5  ;;  %1111 = vmatpush.msra.mxu2 %v336_v5  ;;  %v327_v13 = vld [vmem:[%s1918_s18 + $0x28] sm:$0xff]  ;;  %v329_v15 = vld [vmem:[%s1918_s18 + $0x38] sm:$0xff] }
  0x66   : > { %s1105_s0 = sshll.u32 %s2432_s29, 3 }
  0x67   : > { %437 = vmatpush.msra.mxu0 %v335_v6  ;;  %1112 = vmatpush.msra.mxu2 %v335_v6  ;;  %s1106_s3 = sshll.u32 %s2433_s8, 4 }
  0x68   : > { %s921_s25 = sadd.s32 %s1106_s3, %s1105_s0 }
  0x69   : > { %347 = vxpose.xlu0.b32.cont [2/8] (short) %v323_v1, 128  ;;  %438 = vmatpush.msra.mxu0 %v334_v7  ;;  %s1107_s10 = sshll.u32 %s921_s25, 3 }
  0x6a   : > { %1113 = vmatpush.msra.mxu2 %v334_v7  ;;  %s923_s18 = scalar_lea.hbm %s2435_s2, %s1107_s10 }
  0x6b   : > { %439 = vmatpush.msra.mxu0 %v333_v9  ;;  %s926_s1 = sshll.u32 %s923_s18, 4  ;;  %s927_s1 = int_to_ptr.hbm [resolvable:$true] %s926_s1 }
  0x6c   : > { %1114 = vmatpush.msra.mxu2 %v333_v9  ;;  %s1484_s4 = sshra.s32 %s927_s1, 4  ;;  %s1485_s4 = int_to_ptr.hbm [resolvable:$true] %s1484_s4 }
  0x6d   : > { %440 = vmatpush.msra.mxu0 %v332_v10  ;;  %s1486_s12 = scalar_lea.hbm %s1485_s4, 64  ;;  %p1491_p10 = scmp.lt.s32.totalorder %s1485_s4, %s2435_s2 }
  0x6e   : > { %1115 = vmatpush.msra.mxu2 %v332_v10  ;;  %p1487_p2 = scmp.ne.s32.totalorder %s1485_s4, %s1486_s12 }
  0x6f   : > { %441 = vmatpush.msra.mxu0 %v331_v11 }
  0x70   : > { %1116 = vmatpush.msra.mxu2 %v331_v11  ;;  %p1488_p8 = pnand %p1487_p2, %p1820_p0 }
  0x71   : > { %348 = vxpose.xlu0.b32.cont [3/8] (short) %v324_v2, 128  ;;  %442 = vmatpush.msra.mxu0 %v330_v12 }
  0x72   : > { %1117 = vmatpush.msra.mxu2 %v330_v12  ;;  %p1489_p4 = pneg %p1488_p8 }
  0x79   : > { %349 = vxpose.xlu0.b32.cont [4/8] (short) %v325_v3, 128 }
  0x81   : > { %350 = vxpose.xlu0.b32.cont [5/8] (short) %v326_v8, 128 }
  0x89   : > { %351 = vxpose.xlu0.b32.cont [6/8] (short) %v327_v13, 128 }
  0x91   : > { %352 = vxpose.xlu0.b32.cont [7/8] (short) %v328_v14, 128 }
  0x99   : > { %353 = vxpose.xlu0.b32.end [8/8] (short) %v329_v15, 128 }
 0x105   : > { %v362_v16 = vpop.trf.xlu0 }
 0x106   : > { %1088 = vmatmul.msk.f32.vlgmr.msra.gmra.mxu0 %vm378_vm0, %v362_v16 }
 0x10d   : > { %v363_v17 = vpop.trf.xlu0 }
 0x10e   : > { %1089 = vmatmul.msk.f32.gmra.mxu0 %vm378_vm0, %v363_v17 }
 0x115   : > { %v364_v18 = vpop.trf.xlu0 }
 0x116   : > { %1090 = vmatmul.msk.f32.gmra.mxu0 %vm378_vm0, %v364_v18 }
 0x11d   : > { %v365_v19 = vpop.trf.xlu0 }
 0x11e   : > { %1091 = vmatmul.msk.f32.gmra.mxu0 %vm378_vm0, %v365_v19 }
 0x125   : > { %v366_v20 = vpop.trf.xlu0 }
 0x126   : > { %1092 = vmatmul.msk.f32.gmra.mxu0 %vm378_vm0, %v366_v20 }
 0x12d   : > { %v367_v21 = vpop.trf.xlu0 }
 0x12e   : > { %1093 = vmatmul.msk.f32.gmra.mxu0 %vm378_vm0, %v367_v21 }
 0x135   : > { %v368_v22 = vpop.trf.xlu0 }
 0x136   : > { %1094 = vmatmul.msk.f32.gmra.mxu0 %vm378_vm0, %v368_v22 }
 0x13d   : > { %v369_v23 = vpop.trf.xlu0 }
 0x13e   : > { %1095 = vmatmul.msk.f32.vlgmr.msra.gmra.mxu2 %vm378_vm0, %v369_v23 }
 0x145   : > { %v370_v24 = vpop.trf.xlu0 }
 0x146   : > { %1096 = vmatmul.msk.f32.gmra.mxu2 %vm378_vm0, %v370_v24 }
 0x14d   : > { %v371_v25 = vpop.trf.xlu0 }
 0x14e   : > { %1097 = vmatmul.msk.f32.gmra.mxu2 %vm378_vm0, %v371_v25 }
 0x155   : > { %v372_v26 = vpop.trf.xlu0 }
 0x156   : > { %1098 = vmatmul.msk.f32.gmra.mxu2 %vm378_vm0, %v372_v26 }
 0x15d   : > { %v373_v27 = vpop.trf.xlu0 }
 0x15e   : > { %1099 = vmatmul.msk.f32.gmra.mxu2 %vm378_vm0, %v373_v27 }
 0x165   : > { %v374_v28 = vpop.trf.xlu0 }
 0x166   : > { %1100 = vmatmul.msk.f32.gmra.mxu2 %vm378_vm0, %v374_v28 }
 0x16d   : > { %v375_v29 = vpop.trf.xlu0 }
 0x16e   : > { %1101 = vmatmul.msk.f32.gmra.mxu2 %vm378_vm0, %v375_v29 }
 0x175   : > { %v376_v30 = vpop.trf.xlu0 }
 0x176   : > { %1102 = vmatmul.msk.f32.gmra.mxu2 %vm378_vm0, %v376_v30 }
 0x17d   : > { %v377_v31 = vpop.trf.xlu0 }
 0x17e   : > { %1103 = vmatmul.msk.f32.gmra.mxu2 %vm378_vm0, %v377_v31 }
 0x183   : > { %v1971_v32 = vpop.f32.mrf.mxu0 }
 0x184   : > { %v2012_v31 = vmul.f32 0.125, %v1971_v32 }
 0x18b   : > { %v447_v33 = vpop.f32.mrf.mxu0 }
 0x18c   : > { %v1973_v34 = vmul.f32 0.125, %v447_v33 }
 0x18e   : > { %510 = vmax.xlane.f32.xlu0 %v1973_v34 }
 0x193   : > { %v450_v39 = vpop.f32.mrf.mxu0 }
 0x194   : > { %v1991_v62 = vmul.f32 0.125, %v450_v39 }
 0x19b   : > { %v453_v41 = vpop.f32.mrf.mxu0 }
 0x19c   : > { %v1988_v61 = vmul.f32 0.125, %v453_v41 }
 0x1a3   : > { %v456_v46 = vpop.f32.mrf.mxu0 }
 0x1a4   : > { %v1976_v57 = vmul.f32 0.125, %v456_v46 }
 0x1ab   : > { %v459_v50 = vpop.f32.mrf.mxu0 }
 0x1ac   : > { %v1985_v60 = vmul.f32 0.125, %v459_v50 }
 0x1b3   : > { %v462_v54 = vpop.f32.mrf.mxu0 }
 0x1b4   : > { %v498_v55 = vmul.f32 0.125, %v462_v54 }
 0x1c1   : > { %v465_v35 = vpop.f32.mrf.mxu2 }
 0x1c2   : > { %v1982_v59 = vmul.f32 0.125, %v465_v35 }
 0x1c9   : > { %v468_v36 = vpop.f32.mrf.mxu2 }
 0x1ca   : > { %v500_v52 = vmul.f32 0.125, %v468_v36 }
 0x1d1   : > { %v471_v37 = vpop.f32.mrf.mxu2 }
 0x1d2   : > { %v1978_v58 = vmul.f32 0.125, %v471_v37 }
 0x1d9   : > { %v474_v38 = vpop.f32.mrf.mxu2 }
 0x1da   : > { %v502_v48 = vmul.f32 0.125, %v474_v38 }
 0x1e1   : > { %v477_v40 = vpop.f32.mrf.mxu2 }
 0x1e2   : > { %v503_v56 = vmul.f32 0.125, %v477_v40 }
 0x1e9   : > { %v480_v42 = vpop.f32.mrf.mxu2 }
 0x1ea   : > { %v504_v43 = vmul.f32 0.125, %v480_v42 }
 0x1ec   : > { %532 = vmax.xlane.f32.xlu2 %v504_v43 }
 0x1f1   : > { %v483_v44 = vpop.f32.mrf.mxu2 }
 0x1f2   : > { %v505_v45 = vmul.f32 0.125, %v483_v44 }
 0x1f4   : > { %534 = vmax.xlane.f32.xlu2 %v505_v45 }
 0x1f9   : > { %v486_v47 = vpop.f32.mrf.mxu2 }
 0x1fa   : > { %v506_v49 = vmul.f32 0.125, %v486_v47 }
 0x1fc   : > { %528 = vmax.xlane.f32.xlu2 %v502_v48  ;;  %536 = vmax.xlane.f32.xlu1 %v506_v49 }
 0x201   : > { %v489_v51 = vpop.f32.mrf.mxu2 }
 0x202   : > { %v507_v53 = vmul.f32 0.125, %v489_v51 }
 0x204   : > { %524 = vmax.xlane.f32.xlu2 %v500_v52  ;;  %538 = vmax.xlane.f32.xlu1 %v507_v53 }
 0x20c   : > { %520 = vmax.xlane.f32.xlu2 %v498_v55  ;;  %530 = vmax.xlane.f32.xlu1 %v503_v56 }
 0x214   : > { %516 = vmax.xlane.f32.xlu2 %v1976_v57  ;;  %526 = vmax.xlane.f32.xlu1 %v1978_v58 }
 0x21c   : > { %522 = vmax.xlane.f32.xlu1 %v1982_v59 }
 0x224   : > { %518 = vmax.xlane.f32.xlu1 %v1985_v60 }
 0x22c   : > { %514 = vmax.xlane.f32.xlu1 %v1988_v61 }
 0x234   : > { %512 = vmax.xlane.f32.xlu1 %v1991_v62 }
 0x25f   : > { %v533_v63 = vpop.xlane.xlu2 %532 }
 0x260   : > { %v552_v3 = vsub.f32 %v504_v43, %v533_v63 }
 0x262   : > { %v580_v6 = vmul.f32 1.442695, %v552_v3 }
 0x267   : > { %v535_v0 = vpop.xlane.xlu2 %534 }
 0x268   : > { %v553_v1 = vsub.f32 %v505_v45, %v535_v0 }
 0x26a   : > { %v582_v2 = vmul.f32 1.442695, %v553_v1 }
 0x26c   : > { %1316 = vpow2.f32 %v582_v2 }
 0x26d   : > { %1318 = vpow2.f32 %v580_v6 }
 0x26f   : > { %v529_v4 = vpop.xlane.xlu2 %528  ;;  %v537_v5 = vpop.xlane.xlu1 %536 }
 0x270   : > { %v554_v7 = vsub.f32 %v506_v49, %v537_v5  ;;  %v550_v10 = vsub.f32 %v502_v48, %v529_v4 }
 0x272   : > { %v1994_v8 = vpop.eup %1316  ;;  %v584_v9 = vmul.f32 1.442695, %v554_v7  ;;  %v576_v13 = vmul.f32 1.442695, %v550_v10 }
 0x273   : > { %614 = vadd.xlane.f32.xlu1 %v1994_v8  ;;  %v1997_v15 = vpop.eup %1318 }
 0x274   : > { %1320 = vpow2.f32 %v584_v9 }
 0x275   : > { %1322 = vpow2.f32 %v576_v13 }
 0x277   : > { %v525_v11 = vpop.xlane.xlu2 %524  ;;  %v539_v12 = vpop.xlane.xlu1 %538 }
 0x278   : > { %v555_v14 = vsub.f32 %v507_v53, %v539_v12  ;;  %v548_v18 = vsub.f32 %v500_v52, %v525_v11  ;;  %v511_v53 = vpop.xlane.xlu0 %510 }
 0x27a   : > { %v586_v16 = vmul.f32 1.442695, %v555_v14  ;;  %v1999_v17 = vpop.eup %1320  ;;  %v572_v21 = vmul.f32 1.442695, %v548_v18 }
 0x27b   : > { %612 = vadd.xlane.f32.xlu1 %v1997_v15  ;;  %616 = vadd.xlane.f32.xlu2 %v1999_v17  ;;  %v2003_v22 = vpop.eup %1322 }
 0x27c   : > { %1324 = vpow2.f32 %v586_v16 }
 0x27d   : > { %1326 = vpow2.f32 %v572_v21 }
 0x27f   : > { %v521_v19 = vpop.xlane.xlu2 %520  ;;  %v531_v20 = vpop.xlane.xlu1 %530 }
 0x280   : > { %v546_v24 = vsub.f32 %v498_v55, %v521_v19  ;;  %v551_v25 = vsub.f32 %v503_v56, %v531_v20  ;;  %v541_v56 = vsub.f32 %v1973_v34, %v511_v53 }
 0x282   : > { %v2005_v23 = vpop.eup %1324  ;;  %v568_v27 = vmul.f32 1.442695, %v546_v24  ;;  %v578_v28 = vmul.f32 1.442695, %v551_v25 }
 0x283   : > { %608 = vadd.xlane.f32.xlu1 %v2003_v22  ;;  %618 = vadd.xlane.f32.xlu2 %v2005_v23  ;;  %v2009_v30 = vpop.eup %1326 }
 0x284   : > { %1328 = vpow2.f32 %v568_v27 }
 0x285   : > { %1330 = vpow2.f32 %v578_v28 }
 0x287   : > { %v527_v26 = vpop.xlane.xlu1 %526  ;;  %v517_v29 = vpop.xlane.xlu2 %516 }
 0x288   : > { %v544_v33 = vsub.f32 %v1976_v57, %v517_v29  ;;  %v549_v35 = vsub.f32 %v1978_v58, %v527_v26  ;;  %v558_v57 = vmul.f32 1.442695, %v541_v56 }
 0x28a   : > { %v564_v37 = vmul.f32 1.442695, %v544_v33  ;;  %v574_v38 = vmul.f32 1.442695, %v549_v35  ;;  %v2018_v39 = vpop.eup %1328 }
 0x28b   : > { %604 = vadd.xlane.f32.xlu1 %v2009_v30  ;;  %508 = vmax.xlane.f32.xlu2 %v2012_v31  ;;  %v2020_v40 = vpop.eup %1330 }
 0x28c   : > { %1332 = vpow2.f32 %v564_v37 }
 0x28d   : > { %1334 = vpow2.f32 %v574_v38 }
 0x28f   : > { %v523_v36 = vpop.xlane.xlu1 %522 }
 0x290   : > { %v547_v32 = vsub.f32 %v1982_v59, %v523_v36 }
 0x292   : > { %v570_v42 = vmul.f32 1.442695, %v547_v32  ;;  %v2025_v43 = vpop.eup %1332 }
 0x293   : > { %600 = vadd.xlane.f32.xlu1 %v2018_v39  ;;  %610 = vadd.xlane.f32.xlu2 %v2020_v40  ;;  %v2027_v44 = vpop.eup %1334 }
 0x294   : > { %1336 = vpow2.f32 %v570_v42 }
 0x297   : > { %v519_v41 = vpop.xlane.xlu1 %518 }
 0x298   : > { %v545_v45 = vsub.f32 %v1985_v60, %v519_v41 }
 0x29a   : > { %v566_v47 = vmul.f32 1.442695, %v545_v45  ;;  %v2032_v48 = vpop.eup %1336 }
 0x29b   : > { %596 = vadd.xlane.f32.xlu1 %v2025_v43  ;;  %606 = vadd.xlane.f32.xlu2 %v2027_v44 }
 0x29c   : > { %1338 = vpow2.f32 %v566_v47 }
 0x29f   : > { %v515_v46 = vpop.xlane.xlu1 %514 }
 0x2a0   : > { %v543_v49 = vsub.f32 %v1988_v61, %v515_v46 }
 0x2a2   : > { %v562_v52 = vmul.f32 1.442695, %v543_v49  ;;  %v2037_v55 = vpop.eup %1338 }
 0x2a3   : > { %602 = vadd.xlane.f32.xlu2 %v2032_v48 }
 0x2a7   : > { %v513_v50 = vpop.xlane.xlu1 %512 }
 0x2a8   : > { %v542_v51 = vsub.f32 %v1991_v62, %v513_v50 }
 0x2aa   : > { %v560_v54 = vmul.f32 1.442695, %v542_v51 }
 0x2ab   : > { %598 = vadd.xlane.f32.xlu2 %v2037_v55 }
 0x2ac   : > { %1340 = vpow2.f32 %v560_v54 }
 0x2ad   : > { %1342 = vpow2.f32 %v562_v52 }
 0x2ae   : > { %1344 = vpow2.f32 %v558_v57 }
 0x2b2   : > { %v2041_v58 = vpop.eup %1340 }
 0x2b3   : > { %v2043_v59 = vpop.eup %1342  ;;  %592 = vadd.xlane.f32.xlu1 %v2041_v58 }
 0x2b4   : > { %594 = vadd.xlane.f32.xlu2 %v2043_v59  ;;  %v2047_v60 = vpop.eup %1344 }
 0x2bc   : > { %590 = vadd.xlane.f32.xlu2 %v2047_v60 }
 0x2e6   : > { %v2050_v61 = vpop.xlane.xlu1 %614 }
 0x2e7   : > { %v826_v47 = vand.u32 2147483648, %v2050_v61  ;;  %v824_v51 = vand.u32 2147483647, %v2050_v61  ;;  %vm820_vm9 = vweird.f32 %v2050_v61 }
 0x2e9   : > { %vm825_vm13 = vcmp.eq.f32.partialorder %v824_v51, 8.507059e+37 }
 0x2ee   : > { %v2052_v62 = vpop.xlane.xlu1 %612  ;;  %v617_v34 = vpop.xlane.xlu2 %616 }
 0x2ef   : > { %1346 = vrcp.f32 %v617_v34  ;;  %v841_v29 = vand.u32 2147483648, %v617_v34  ;;  %vm835_vm4 = vweird.f32 %v617_v34  ;;  %v839_v36 = vand.u32 2147483647, %v617_v34 }
 0x2f0   : > { %1348 = vrcp.f32 %v2050_v61  ;;  %vm805_vm14 = vweird.f32 %v2052_v62 }
 0x2f1   : > { %1350 = vrcp.f32 %v2052_v62  ;;  %v842_v49 = vor.u32 1.1754944e-38, %v841_v29  ;;  %vm840_vm10 = vcmp.eq.f32.partialorder %v839_v36, 8.507059e+37 }
 0x2f5   : > { %v1347_v63 = vpop.eup %1346 }
 0x2f6   : > { %v2056_v0 = vpop.xlane.xlu1 %608  ;;  %v2058_v1 = vpop.eup %1348  ;;  %v831_v3 = vmul.f32 %v1347_v63, %v617_v34  ;;  %vm836_vm2 = vweird.f32 %v1347_v63 }
 0x2f7   : > { %v619_v2 = vpop.xlane.xlu2 %618  ;;  %v816_v4 = vmul.f32 %v2058_v1, %v2050_v61  ;;  %v2062_v5 = vpop.eup %1350  ;;  %vm821_vm6 = vweird.f32 %v2058_v1  ;;  %vm2085_vm7 = vmor %vm835_vm4, %vm836_vm2 }
 0x2f8   : > { %1352 = vrcp.f32 %v619_v2  ;;  %v832_v6 = vsub.f32 1.0, %v831_v3  ;;  %v801_v10 = vmul.f32 %v2062_v5, %v2052_v62  ;;  %v856_v26 = vand.u32 2147483648, %v619_v2  ;;  %vm2105_vm11 = vmor %vm820_vm9, %vm821_vm6 }
 0x2f9   : > { %1354 = vrcp.f32 %v2056_v0  ;;  %v817_v9 = vsub.f32 1.0, %v816_v4  ;;  %v854_v27 = vand.u32 2147483647, %v619_v2  ;;  %vm850_vm3 = vweird.f32 %v619_v2 }
 0x2fa   : > { %v833_v13 = vmul.f32 %v1347_v63, %v832_v6  ;;  %v802_v24 = vsub.f32 1.0, %v801_v10  ;;  %v857_v37 = vor.u32 1.1754944e-38, %v856_v26  ;;  %vm806_vm12 = vweird.f32 %v2062_v5 }
 0x2fb   : > { %v818_v19 = vmul.f32 %v2058_v1, %v817_v9  ;;  %vm855_vm8 = vcmp.eq.f32.partialorder %v854_v27, 8.507059e+37  ;;  %v811_v3 = vand.u32 2147483648, %v2052_v62  ;;  %v809_v4 = vand.u32 2147483647, %v2052_v62  ;;  %vm2127_vm15 = vmor %vm805_vm14, %vm806_vm12 }
 0x2fc   : > { %v834_v28 = vadd.f32 %v1347_v63, %v833_v13  ;;  %v803_v45 = vmul.f32 %v2062_v5, %v802_v24 }
 0x2fd   : > { %v819_v42 = vadd.f32 %v2058_v1, %v818_v19  ;;  %v812_v13 = vor.u32 1.1754944e-38, %v811_v3  ;;  %vm810_vm0 = vcmp.eq.f32.partialorder %v809_v4, 8.507059e+37 }
 0x2fe   : > { %v1353_v7 = vpop.eup %1352  ;;  %v2068_v16 = vpop.xlane.xlu1 %604  ;;  %v838_v46 = vsel %vm2085_vm7, %v1347_v63, %v834_v28  ;;  %v804_v63 = vadd.f32 %v2062_v5, %v803_v45 }
 0x2ff   : > { %v846_v11 = vmul.f32 %v1353_v7, %v619_v2  ;;  %v509_v12 = vpop.xlane.xlu2 %508  ;;  %v2071_v21 = vpop.eup %1354  ;;  %vm851_vm1 = vweird.f32 %v1353_v7  ;;  %v843_v57 = vsel %vm840_vm10, %v842_v49, %v838_v46  ;;  %v823_v61 = vsel %vm2105_vm11, %v2058_v1, %v819_v42 }
 0x300   : > { %v540_v14 = vsub.f32 %v2012_v31, %v509_v12  ;;  %v771_v31 = vmul.f32 %v2071_v21, %v2056_v0  ;;  %vm2075_vm5 = vmor %vm850_vm3, %vm851_vm1  ;;  %v827_v2 = vor.u32 1.1754944e-38, %v826_v47  ;;  %v844_v1 = vmul.f32 %v1999_v17, %v843_v57 }
 0x301   : > { %v847_v18 = vsub.f32 1.0, %v846_v11  ;;  %v808_v17 = vsel %vm2127_vm15, %v2062_v5, %v804_v63  ;;  %vm776_vm1 = vweird.f32 %v2071_v21  ;;  %vm775_vm3 = vweird.f32 %v2056_v0 }
 0x302   : > { %v556_v20 = vmul.f32 1.442695, %v540_v14  ;;  %v772_v53 = vsub.f32 1.0, %v771_v31  ;;  %v828_v11 = vsel %vm825_vm13, %v827_v2, %v823_v61  ;;  %v781_v5 = vand.u32 2147483648, %v2056_v0 }
 0x303   : > { %v848_v25 = vmul.f32 %v1353_v7, %v847_v18  ;;  %v829_v19 = vmul.f32 %v1994_v8, %v828_v11  ;;  %v779_v31 = vand.u32 2147483647, %v2056_v0  ;;  %v751_v63 = vand.u32 2147483648, %v2068_v16 }
 0x304   : > { %1356 = vpow2.f32 %v556_v20  ;;  %v782_v45 = vor.u32 1.1754944e-38, %v781_v5  ;;  %vm745_vm12 = vweird.f32 %v2068_v16 }
 0x305   : > { %v849_v33 = vadd.f32 %v1353_v7, %v848_v25  ;;  %1358 = vrcp.f32 %v2068_v16  ;;  %v813_v25 = vsel %vm810_vm0, %v812_v13, %v808_v17 }
 0x306   : > { %v2099_v54 = vpop.xlane.xlu1 %600 }
 0x307   : > { %v2081_v38 = vpop.xlane.xlu2 %610  ;;  %v853_v32 = vsel %vm2075_vm5, %v1353_v7, %v849_v33  ;;  %v773_v7 = vmul.f32 %v2071_v21, %v772_v53  ;;  %vm2151_vm5 = vmor %vm775_vm3, %vm776_vm1  ;;  %vm715_vm3 = vweird.f32 %v2099_v54  ;;  %v719_v33 = vand.u32 2147483647, %v2099_v54 }
 0x308   : > { %1360 = vrcp.f32 %v2081_v38  ;;  %v858_v50 = vsel %vm855_vm8, %v857_v37, %v853_v32  ;;  %v796_v18 = vand.u32 2147483648, %v2081_v38  ;;  %v794_v8 = vand.u32 2147483647, %v2081_v38 }
 0x309   : > { %v859_v56 = vmul.f32 %v2005_v23, %v858_v50  ;;  %1362 = vrcp.f32 %v2099_v54  ;;  %v774_v20 = vadd.f32 %v2071_v21, %v773_v7  ;;  %vm790_vm4 = vweird.f32 %v2081_v38 }
 0x30a   : > { %v2096_v52 = vpop.eup %1356  ;;  %v797_v36 = vor.u32 1.1754944e-38, %v796_v18  ;;  %v814_v37 = vmul.f32 %v1997_v15, %v813_v25  ;;  %vm795_vm7 = vcmp.eq.f32.partialorder %v794_v8, 8.507059e+37  ;;  %vm780_vm8 = vcmp.eq.f32.partialorder %v779_v31, 8.507059e+37 }
 0x30b   : > { %588 = vadd.xlane.f32.xlu1 %v2096_v52  ;;  %860 = vmatpush.xpose.msrb.mxu0 %v859_v56  ;;  %v2114_v23 = vpop.eup %1358  ;;  %v721_v25 = vand.u32 2147483648, %v2099_v54 }
 0x30c   : > { %1118 = vmatpush.xpose.msra.mxu1 %v859_v56  ;;  %1119 = vmatpush.xpose.msra.mxu3 %v859_v56  ;;  %v741_v62 = vmul.f32 %v2114_v23, %v2068_v16  ;;  %vm746_vm10 = vweird.f32 %v2114_v23 }
 0x30d   : > { %vm2194_vm15 = vmor %vm745_vm12, %vm746_vm10  ;;  %v722_v32 = vor.u32 1.1754944e-38, %v721_v25 }
 0x30e   : > { %v1361_v6 = vpop.eup %1360  ;;  %v742_v27 = vsub.f32 1.0, %v741_v62  ;;  %v2145_v28 = vpop.xlane.xlu1 %596  ;;  %v752_v62 = vor.u32 1.1754944e-38, %v751_v63 }
 0x30f   : > { %v786_v9 = vmul.f32 %v1361_v6, %v2081_v38  ;;  %v2123_v10 = vpop.xlane.xlu2 %606  ;;  %861 = vmatpush.xpose.msrb.mxu0 %v844_v1  ;;  %vm791_vm2 = vweird.f32 %v1361_v6  ;;  %v2141_v26 = vpop.eup %1362  ;;  %v778_v38 = vsel %vm2151_vm5, %v2071_v21, %v774_v20  ;;  %vm685_vm12 = vweird.f32 %v2145_v28 }
 0x310   : > { %1120 = vmatpush.xpose.msra.mxu1 %v844_v1  ;;  %1364 = vrcp.f32 %v2123_v10  ;;  %1121 = vmatpush.xpose.msra.mxu3 %v844_v1  ;;  %vm2158_vm6 = vmor %vm790_vm4, %vm791_vm2  ;;  %v711_v41 = vmul.f32 %v2141_v26, %v2099_v54  ;;  %v743_v46 = vmul.f32 %v2114_v23, %v742_v27  ;;  %v766_v49 = vand.u32 2147483648, %v2123_v10 }
 0x311   : > { %v787_v14 = vsub.f32 1.0, %v786_v9  ;;  %1366 = vrcp.f32 %v2145_v28  ;;  %v783_v51 = vsel %vm780_vm8, %v782_v45, %v778_v38  ;;  %v764_v57 = vand.u32 2147483647, %v2123_v10 }
 0x312   : > { %v712_v53 = vsub.f32 1.0, %v711_v41  ;;  %v744_v34 = vadd.f32 %v2114_v23, %v743_v46  ;;  %vm760_vm11 = vweird.f32 %v2123_v10  ;;  %v767_v3 = vor.u32 1.1754944e-38, %v766_v49 }
 0x313   : > { %v788_v24 = vmul.f32 %v1361_v6, %v787_v14  ;;  %862 = vmatpush.xpose.msrb.mxu0 %v829_v19  ;;  %v784_v4 = vmul.f32 %v2003_v22, %v783_v51  ;;  %vm765_vm14 = vcmp.eq.f32.partialorder %v764_v57, 8.507059e+37  ;;  %vm716_vm1 = vweird.f32 %v2141_v26 }
 0x314   : > { %1122 = vmatpush.xpose.msra.mxu1 %v829_v19  ;;  %1123 = vmatpush.xpose.msra.mxu3 %v829_v19  ;;  %v713_v7 = vmul.f32 %v2141_v26, %v712_v53  ;;  %v748_v12 = vsel %vm2194_vm15, %v2114_v23, %v744_v34  ;;  %vm2217_vm5 = vmor %vm715_vm3, %vm716_vm1  ;;  %vm720_vm8 = vcmp.eq.f32.partialorder %v719_v33, 8.507059e+37 }
 0x315   : > { %v789_v29 = vadd.f32 %v1361_v6, %v788_v24 }
 0x316   : > { %v1365_v35 = vpop.eup %1364  ;;  %v714_v20 = vadd.f32 %v2141_v26, %v713_v7 }
 0x317   : > { %v756_v42 = vmul.f32 %v1365_v35, %v2123_v10  ;;  %v2169_v0 = vpop.xlane.xlu2 %602  ;;  %v793_v15 = vsel %vm2158_vm6, %v1361_v6, %v789_v29  ;;  %863 = vmatpush.xpose.msrb.mxu0 %v814_v37  ;;  %vm761_vm9 = vweird.f32 %v1365_v35  ;;  %v2180_v61 = vpop.eup %1366  ;;  %v749_v6 = vand.u32 2147483647, %v2068_v16 }
 0x318   : > { %1368 = vrcp.f32 %v2169_v0  ;;  %1124 = vmatpush.xpose.msra.mxu1 %v814_v37  ;;  %1125 = vmatpush.xpose.msra.mxu3 %v814_v37  ;;  %v798_v47 = vsel %vm795_vm7, %v797_v36, %v793_v15  ;;  %vm762_vm13 = vmor %vm760_vm11, %vm761_vm9  ;;  %v681_v22 = vmul.f32 %v2180_v61, %v2145_v28  ;;  %v736_v18 = vand.u32 2147483648, %v2169_v0 }
 0x319   : > { %v757_v21 = vsub.f32 1.0, %v756_v42  ;;  %v799_v50 = vmul.f32 %v2020_v40, %v798_v47  ;;  %vm750_vm0 = vcmp.eq.f32.partialorder %v749_v6, 8.507059e+37  ;;  %v734_v23 = vand.u32 2147483647, %v2169_v0 }
 0x31a   : > { %v753_v19 = vsel %vm750_vm0, %v752_v62, %v748_v12  ;;  %v682_v24 = vsub.f32 1.0, %v681_v22  ;;  %vm730_vm4 = vweird.f32 %v2169_v0  ;;  %v737_v31 = vor.u32 1.1754944e-38, %v736_v18 }
 0x31b   : > { %v758_v56 = vmul.f32 %v1365_v35, %v757_v21  ;;  %864 = vmatpush.xpose.msrb.mxu0 %v799_v50  ;;  %v754_v27 = vmul.f32 %v2009_v30, %v753_v19  ;;  %v718_v30 = vsel %vm2217_vm5, %v2141_v26, %v714_v20  ;;  %vm735_vm7 = vcmp.eq.f32.partialorder %v734_v23, 8.507059e+37 }
 0x31c   : > { %1126 = vmatpush.xpose.msra.mxu1 %v799_v50  ;;  %1127 = vmatpush.xpose.msra.mxu3 %v799_v50  ;;  %v683_v37 = vmul.f32 %v2180_v61, %v682_v24  ;;  %v723_v45 = vsel %vm720_vm8, %v722_v32, %v718_v30  ;;  %vm686_vm10 = vweird.f32 %v2180_v61  ;;  %v691_v47 = vand.u32 2147483648, %v2145_v28 }
 0x31d   : > { %v759_v40 = vadd.f32 %v1365_v35, %v758_v56  ;;  %v724_v51 = vmul.f32 %v2018_v39, %v723_v45  ;;  %v689_v56 = vand.u32 2147483647, %v2145_v28  ;;  %v339_v45 = vld [vmem:[%s1933_s26 + $0x8] sm:$0xff] }
 0x31e   : > { %v1369_v2 = vpop.eup %1368  ;;  %v684_v46 = vadd.f32 %v2180_v61, %v683_v37 }
 0x31f   : > { %v726_v1 = vmul.f32 %v1369_v2, %v2169_v0  ;;  %v2190_v9 = vpop.xlane.xlu2 %598  ;;  %v763_v11 = vsel %vm762_vm13, %v1365_v35, %v759_v40  ;;  %865 = vmatpush.xpose.msrb.mxu0 %v784_v4  ;;  %vm731_vm2 = vweird.f32 %v1369_v2  ;;  %vm690_vm0 = vcmp.eq.f32.partialorder %v689_v56, 8.507059e+37 }
 0x320   : > { %1370 = vrcp.f32 %v2190_v9  ;;  %1128 = vmatpush.xpose.msra.mxu1 %v784_v4  ;;  %v768_v16 = vsel %vm765_vm14, %v767_v3, %v763_v11  ;;  %1129 = vmatpush.xpose.msra.mxu3 %v784_v4  ;;  %vm732_vm6 = vmor %vm730_vm4, %vm731_vm2  ;;  %v706_v15 = vand.u32 2147483648, %v2190_v9  ;;  %v704_v26 = vand.u32 2147483647, %v2190_v9 }
 0x321   : > { %v727_v17 = vsub.f32 1.0, %v726_v1  ;;  %v769_v13 = vmul.f32 %v2027_v44, %v768_v16  ;;  %vm700_vm11 = vweird.f32 %v2190_v9  ;;  %vm2256_vm14 = vmor %vm685_vm12, %vm686_vm10  ;;  %v692_v3 = vor.u32 1.1754944e-38, %v691_v47  ;;  %v343_v47 = vld [vmem:[%s1933_s26 + $0x28] sm:$0xff] }
 0x322   : > { %v707_v57 = vor.u32 1.1754944e-38, %v706_v15  ;;  %vm705_vm15 = vcmp.eq.f32.partialorder %v704_v26, 8.507059e+37  ;;  %v688_v28 = vsel %vm2256_vm14, %v2180_v61, %v684_v46  ;;  %v338_v26 = vld [vmem:[%s1933_s26] sm:$0xff] }
 0x323   : > { %v728_v14 = vmul.f32 %v1369_v2, %v727_v17  ;;  %866 = vmatpush.xpose.msrb.mxu0 %v769_v13  ;;  %v693_v10 = vsel %vm690_vm0, %v692_v3, %v688_v28  ;;  %v342_v46 = vld [vmem:[%s1933_s26 + $0x20] sm:$0xff] }
 0x324   : > { %1130 = vmatpush.xpose.msra.mxu1 %v769_v13  ;;  %1131 = vmatpush.xpose.msra.mxu3 %v769_v13  ;;  %v694_v17 = vmul.f32 %v2025_v43, %v693_v10 }
 0x325   : > { %v729_v44 = vadd.f32 %v1369_v2, %v728_v14 }
 0x326   : > { %v1371_v5 = vpop.eup %1370  ;;  %v2213_v8 = vpop.xlane.xlu1 %592 }
 0x327   : > { %v696_v35 = vmul.f32 %v1371_v5, %v2190_v9  ;;  %v2223_v36 = vpop.xlane.xlu2 %594  ;;  %1372 = vrcp.f32 %v2213_v8  ;;  %867 = vmatpush.xpose.msrb.mxu0 %v754_v27  ;;  %v733_v54 = vsel %vm732_vm6, %v1369_v2, %v729_v44  ;;  %vm701_vm9 = vweird.f32 %v1371_v5 }
 0x328   : > { %1374 = vrcp.f32 %v2223_v36  ;;  %1132 = vmatpush.xpose.msra.mxu1 %v754_v27  ;;  %1133 = vmatpush.xpose.msra.mxu3 %v754_v27  ;;  %v738_v41 = vsel %vm735_vm7, %v737_v31, %v733_v54  ;;  %vm2246_vm13 = vmor %vm700_vm11, %vm701_vm9  ;;  %v676_v7 = vand.u32 2147483648, %v2223_v36  ;;  %v674_v22 = vand.u32 2147483647, %v2223_v36 }
 0x329   : > { %v697_v38 = vsub.f32 1.0, %v696_v35  ;;  %v739_v42 = vmul.f32 %v2032_v48, %v738_v41  ;;  %vm670_vm3 = vweird.f32 %v2223_v36  ;;  %v661_v16 = vand.u32 2147483648, %v2213_v8 }
 0x32a   : > { %vm655_vm4 = vweird.f32 %v2213_v8  ;;  %v659_v13 = vand.u32 2147483647, %v2213_v8  ;;  %vm675_vm6 = vcmp.eq.f32.partialorder %v674_v22, 8.507059e+37 }
 0x32b   : > { %v698_v0 = vmul.f32 %v1371_v5, %v697_v38  ;;  %868 = vmatpush.xpose.msrb.mxu0 %v739_v42  ;;  %v662_v24 = vor.u32 1.1754944e-38, %v661_v16 }
 0x32c   : > { %1134 = vmatpush.xpose.msra.mxu1 %v739_v42  ;;  %1135 = vmatpush.xpose.msra.mxu3 %v739_v42  ;;  %vm660_vm8 = vcmp.eq.f32.partialorder %v659_v13, 8.507059e+37 }
 0x32d   : > { %v2237_v21 = vpop.eup %1372  ;;  %v699_v48 = vadd.f32 %v1371_v5, %v698_v0 }
 0x32e   : > { %v1375_v49 = vpop.eup %1374  ;;  %v651_v50 = vmul.f32 %v2237_v21, %v2213_v8  ;;  %vm656_vm2 = vweird.f32 %v2237_v21 }
 0x32f   : > { %v666_v34 = vmul.f32 %v1375_v49, %v2223_v36  ;;  %v591_v63 = vpop.xlane.xlu2 %590  ;;  %v703_v40 = vsel %vm2246_vm13, %v1371_v5, %v699_v48  ;;  %869 = vmatpush.xpose.msrb.mxu0 %v724_v51  ;;  %vm671_vm1 = vweird.f32 %v1375_v49  ;;  %vm657_vm7 = vmor %vm655_vm4, %vm656_vm2  ;;  %v341_v48 = vld [vmem:[%s1933_s26 + $0x18] sm:$0xff] }
 0x330   : > { %v652_v39 = vsub.f32 1.0, %v651_v50  ;;  %1136 = vmatpush.xpose.msra.mxu1 %v724_v51  ;;  %1376 = vrcp.f32 %v591_v63  ;;  %1137 = vmatpush.xpose.msra.mxu3 %v724_v51  ;;  %v708_v6 = vsel %vm705_vm15, %v707_v57, %v703_v40  ;;  %vm672_vm5 = vmor %vm670_vm3, %vm671_vm1  ;;  %v646_v44 = vand.u32 2147483648, %v591_v63 }
 0x331   : > { %v667_v4 = vsub.f32 1.0, %v666_v34  ;;  %v709_v9 = vmul.f32 %v2037_v55, %v708_v6  ;;  %v677_v55 = vor.u32 1.1754944e-38, %v676_v7  ;;  %v644_v5 = vand.u32 2147483647, %v591_v63 }
 0x332   : > { %v653_v1 = vmul.f32 %v2237_v21, %v652_v39  ;;  %vm640_vm10 = vweird.f32 %v591_v63  ;;  %v647_v29 = vor.u32 1.1754944e-38, %v646_v44 }
 0x333   : > { %v668_v11 = vmul.f32 %v1375_v49, %v667_v4  ;;  %870 = vmatpush.xpose.msrb.mxu0 %v709_v9  ;;  %vm645_vm12 = vcmp.eq.f32.partialorder %v644_v5, 8.507059e+37 }
 0x334   : > { %1138 = vmatpush.xpose.msra.mxu1 %v709_v9  ;;  %v654_v61 = vadd.f32 %v2237_v21, %v653_v1  ;;  %1139 = vmatpush.xpose.msra.mxu3 %v709_v9 }
 0x335   : > { %v669_v12 = vadd.f32 %v1375_v49, %v668_v11 }
 0x336   : > { %v1377_v62 = vpop.eup %1376  ;;  %v658_v20 = vsel %vm657_vm7, %v2237_v21, %v654_v61  ;;  %v340_v21 = vld [vmem:[%s1933_s26 + $0x10] sm:$0xff] }
 0x337   : > { %v636_v14 = vmul.f32 %v1377_v62, %v591_v63  ;;  %v673_v18 = vsel %vm672_vm5, %v1375_v49, %v669_v12  ;;  %871 = vmatpush.xpose.msrb.mxu0 %v694_v17  ;;  %vm641_vm9 = vweird.f32 %v1377_v62  ;;  %v663_v27 = vsel %vm660_vm8, %v662_v24, %v658_v20  ;;  %v344_v49 = vld [vmem:[%s1933_s26 + $0x30] sm:$0xff] }
 0x338   : > { %1140 = vmatpush.xpose.msra.mxu1 %v694_v17  ;;  %v678_v19 = vsel %vm675_vm6, %v677_v55, %v673_v18  ;;  %1141 = vmatpush.xpose.msra.mxu3 %v694_v17  ;;  %vm642_vm11 = vmor %vm640_vm10, %vm641_vm9  ;;  %v664_v33 = vmul.f32 %v2041_v58, %v663_v27 }
 0x339   : > { %v637_v23 = vsub.f32 1.0, %v636_v14  ;;  %v679_v25 = vmul.f32 %v2043_v59, %v678_v19 }
 0x33b   : > { %v638_v43 = vmul.f32 %v1377_v62, %v637_v23  ;;  %872 = vmatpush.xpose.msrb.mxu0 %v679_v25 }
 0x33c   : > { %1142 = vmatpush.xpose.msra.mxu1 %v679_v25  ;;  %1143 = vmatpush.xpose.msra.mxu3 %v679_v25 }
 0x33d   : > { %v639_v8 = vadd.f32 %v1377_v62, %v638_v43 }
 0x33f   : > { %v643_v31 = vsel %vm642_vm11, %v1377_v62, %v639_v8  ;;  %873 = vmatpush.xpose.msrb.mxu0 %v664_v33 }
 0x340   : > { %1144 = vmatpush.xpose.msra.mxu1 %v664_v33  ;;  %v648_v59 = vsel %vm645_vm12, %v647_v29, %v643_v31  ;;  %1145 = vmatpush.xpose.msra.mxu3 %v664_v33 }
 0x341   : > { %v649_v35 = vmul.f32 %v2047_v60, %v648_v59 }
 0x343   : > { %874 = vmatpush.xpose.msrb.mxu0 %v649_v35 }
 0x344   : > { %1146 = vmatpush.xpose.msra.mxu1 %v649_v35  ;;  %1147 = vmatpush.xpose.msra.mxu3 %v649_v35 }
 0x37e   : > { %v589_v36 = vpop.xlane.xlu1 %588 }
 0x37f   : > { %1378 = vrcp.f32 %v589_v36  ;;  %v631_v32 = vand.u32 2147483648, %v589_v36  ;;  %v629_v38 = vand.u32 2147483647, %v589_v36  ;;  %vm625_vm14 = vweird.f32 %v589_v36 }
 0x381   : > { %v632_v60 = vor.u32 1.1754944e-38, %v631_v32  ;;  %vm630_vm0 = vcmp.eq.f32.partialorder %v629_v38, 8.507059e+37 }
 0x385   : > { %v1379_v30 = vpop.eup %1378 }
 0x386   : > { %v621_v37 = vmul.f32 %v1379_v30, %v589_v36  ;;  %vm626_vm13 = vweird.f32 %v1379_v30 }
 0x387   : > { %vm627_vm15 = vmor %vm625_vm14, %vm626_vm13 }
 0x388   : > { %v622_v54 = vsub.f32 1.0, %v621_v37 }
 0x38a   : > { %v623_v58 = vmul.f32 %v1379_v30, %v622_v54 }
 0x38c   : > { %v624_v41 = vadd.f32 %v1379_v30, %v623_v58 }
 0x38e   : > { %v628_v42 = vsel %vm627_vm15, %v1379_v30, %v624_v41 }
 0x38f   : > { %v633_v0 = vsel %vm630_vm0, %v632_v60, %v628_v42 }
 0x390   : > { %v634_v15 = vmul.f32 %v2096_v52, %v633_v0  ;;  %v345_v52 = vld [vmem:[%s1933_s26 + $0x38] sm:$0xff]  ;;  %s1490_s26 = scalar_lea.hbm %s2435_s2, 256 }
 0x391   : > { %p1492_p6 = scmp.lt.s32.totalorder %s1490_s26, %s1486_s12 }
 0x392   : > { %875 = vmatpush.xpose.msrb.mxu0 %v634_v15  ;;  %1148 = vmatpush.xpose.msra.mxu1 %v634_v15 }
 0x393   : > { %1149 = vmatpush.xpose.msra.mxu3 %v634_v15  ;;  %p1493_p7 = por %p1492_p6, %p1491_p10 }
 0x395   : > { %879 = vmatmul.f32.vlgmr.msra.gmra.mxu1 %v339_v45  ;;  %876 = vmatmul.f32.vlgmr.msrb.gmra.mxu0 %v338_v26  ;;  %p1494_p9 = pnand %p1493_p7, %p1489_p4 }
 0x396   : > { %888 = vmatmul.f32.vlgmr.msra.gmra.mxu3 %v342_v46 }
 0x39d   : > { %882 = vmatmul.f32.gmra.mxu1 %v340_v21 }
 0x39e   : > { %891 = vmatmul.f32.gmra.mxu3 %v343_v47 }
 0x3a5   : > { %885 = vmatmul.f32.gmra.mxu1 %v341_v48 }
 0x3a6   : > { %894 = vmatmul.f32.gmra.mxu3 %v344_v49 }
 0x3ae   : > { %897 = vmatmul.f32.gmra.mxu3 %v345_v52 }
 0x412   : > { %v880_v50 = vpop.f32.mrf.mxu1  ;;  %v877_v51 = vpop.f32.mrf.mxu0 }
 0x413   : > { %902 = vst [vmem:[%s312_s30 + $0x8] sm:$0xff] %v880_v50 }
 0x414   : > { %901 = vst [vmem:[%s312_s30] sm:$0xff] %v877_v51 }
 0x419   : > { %v889_v53 = vpop.f32.mrf.mxu3 }
 0x41a   : > { %905 = vst [vmem:[%s312_s30 + $0x20] sm:$0xff] %v889_v53  ;;  %v883_v56 = vpop.f32.mrf.mxu1 }
 0x41b   : > { %903 = vst [vmem:[%s312_s30 + $0x10] sm:$0xff] %v883_v56 }
 0x421   : > { %v892_v57 = vpop.f32.mrf.mxu3 }
 0x422   : > { %906 = vst [vmem:[%s312_s30 + $0x28] sm:$0xff] %v892_v57  ;;  %v886_v34 = vpop.f32.mrf.mxu1 }
 0x423   : > { %904 = vst [vmem:[%s312_s30 + $0x18] sm:$0xff] %v886_v34 }
 0x429   : > { %v895_v63 = vpop.f32.mrf.mxu3 }
 0x42a   : > { %907 = vst [vmem:[%s312_s30 + $0x30] sm:$0xff] %v895_v63 }
 0x431   : > { %v898_v40 = vpop.f32.mrf.mxu3 }
 0x432   : > { %908 = vst [vmem:[%s312_s30 + $0x38] sm:$0xff] %v898_v40 }
 0x433   : > { %1497 = shalt.err (!%p1494_p9)
}
 0x434   : > { %s1652_s11 = smov 128   ;;  %s1653_s24 = smov 8  }
 0x435   : > { %1157 = dma.vmem_to_hbm [thread:$0]  (%p1820_p0), %s925_s27, 1024, %s927_s1, %s910_s14, %s1652_s11, %s1652_s11, %s1653_s24  }
 0x436 PF: > { %s2436_s30 = sld [smem:[#allocation13_spill]]  ;;  %p1174_p5 = scmp.ge.s32.totalorder %s1648_s28, 2 }
 0x438   : > { %p1170_p11 = pnand %p1174_p5, %p1824_p3 }
 0x43a   : > { %p1171_p12 = pneg %p1170_p11 }
 0x43c   : > { %s941_s3 = sand.u32 1, %s2436_s30  }
 0x43d   : > { %s942_s25 = scalar_lea.sflag [#allocation4], %s941_s3 }
 0x43e   : > { %1579 = dma.done.wait (%p1171_p12), %s942_s25, 1024  }
 0x43f   : > { %1581 = vsyncadd (%p1171_p12), %s942_s25, 4294966272  ;;  %s22_s28 = sadd.s32 1, %s1648_s28   ;;  %s2439_s15 = sld [smem:[#allocation14_spill]] }
 0x440   : > { %p2308_p13 = scmp.ge.s32.totalorder %s22_s28, 6   ;;  %s2440_s14 = sld [smem:[#allocation23_spill]] }
 0x441   : > { %s2441_s9 = sld [smem:[#allocation22_spill]]  ;;  %s2447_s12 = smov %s1588_s13 }
 0x442   : > { %s2442_s27 = sld [smem:[#allocation26_spill]]  ;;  %s2452_s18 = smov %s1612_s19 }
 0x443   : > { %s2443_s24 = sld [smem:[#allocation18_spill]]  ;;  %s2453_s19 = smov %s1616_s20 }
 0x444   : > { %s2444_s25 = sld [smem:[#allocation19_spill]]  ;;  %s2455_s21 = smov %s1624_s22 }
 0x445   : > { %s2445_s26 = sld [smem:[#allocation20_spill]]  ;;  %s2448_s13 = smov %s2439_s15 }
 0x446   : > { %s2446_s1 = sld [smem:[#allocation21_spill]]  ;;  %s2449_s15 = smov %s1600_s16 }
 0x447   : > { %s2450_s16 = smov %s1604_s17  ;;  %s2451_s17 = smov %s1897_s5 }
 0x448   : > { %s2454_s20 = smov %s2441_s9  ;;  %s2456_s22 = smov %s1628_s23 }
 0x449   : > { %s2457_s23 = smov %s2442_s27  ;;  %21 = sbr.rel (!%p2308_p13) target bundleno = 19 (0x13), region = 101 }
 0x44c   : > { %s2458_s27 = smov %s2446_s1 }
 0x44e   :  { %948 = vsyncpa [#allocation3], 1 }
 0x44f   :  { %950 = vsyncpa [#allocation3 + $0x1], 1 }
 0x450   :  { %951 = vsyncpa [#allocation6], 1 }
 0x451   :  { %953 = vsyncpa [#allocation6 + $0x1], 1 }
 0x452   :  { %954 = vsyncpa [#allocation4], 1 }
 0x453   :  { %956 = vsyncpa [#allocation4 + $0x1], 1 }

</bundles_post_ra>
